<compile_context>
chip_gen: v7x
topology: tpu7x:2x2x1
jax: 0.10.0
libtpu: 0.0.40
codegen_flags: <defaults>
</compile_context>

<pallas_src>
import jax
import jax.numpy as jnp
from jax.experimental import pallas as pl
from jax.experimental.pallas import tpu as pltpu

_LANE = 128
_SUBLANE = 8


def _linear_relu_kernel(x_ref, w_ref, b_ref, o_ref):
    # x_ref: [Bp, IN] f32, w_ref: [OUTp, IN] f32 (native PyTorch layout),
    # b_ref: [1, OUTp] f32, o_ref: [Bp, OUTp] f32.
    x = x_ref[...].astype(jnp.bfloat16)
    w = w_ref[...].astype(jnp.bfloat16)
    # Contract the IN axis of both operands: (Bp, IN) x (OUTp, IN) -> (Bp, OUTp).
    y = jax.lax.dot_general(
        x, w,
        dimension_numbers=(((1,), (1,)), ((), ())),
        preferred_element_type=jnp.float32)
    y = y + b_ref[...]                      # f32 bias broadcast over batch
    o_ref[...] = jnp.maximum(y, 0.0).astype(o_ref.dtype)


def logistic_regression_forward(x, weight, bias):
    """x: [B, IN] f32, weight: [OUT, IN] f32 (PyTorch layout), bias: [OUT] f32."""
    B, IN = x.shape
    OUT = weight.shape[0]

    # Pad batch to a sublane multiple and OUT to a lane multiple so the output
    # slab is lane-dense (unmasked stores). No-op when already aligned.
    Bp = pl.cdiv(B, _SUBLANE) * _SUBLANE
    OUTp = pl.cdiv(OUT, _LANE) * _LANE
    if Bp != B:
        x = jnp.pad(x, ((0, Bp - B), (0, 0)))
    if OUTp != OUT:
        weight = jnp.pad(weight, ((0, OUTp - OUT), (0, 0)))
        bias = jnp.pad(bias, (0, OUTp - OUT))
    b2d = bias.reshape(1, OUTp)

    out = pl.pallas_call(
        _linear_relu_kernel,
        out_shape=jax.ShapeDtypeStruct((Bp, OUTp), x.dtype),
        in_specs=[
            pl.BlockSpec(memory_space=pltpu.MemorySpace.VMEM),
            pl.BlockSpec(memory_space=pltpu.MemorySpace.VMEM),
            pl.BlockSpec(memory_space=pltpu.MemorySpace.VMEM),
        ],
        out_specs=pl.BlockSpec(memory_space=pltpu.MemorySpace.VMEM),
    )(x, weight, b2d)

    return out[:B, :OUT]


if __name__ == "__main__":
    key = jax.random.PRNGKey(0)
    kx, kw, kb = jax.random.split(key, 3)

    batch, in_features, out_features = 8, 32, 16

    x = jax.random.normal(kx, (batch, in_features), dtype=jnp.float32)
    # Deterministic init mirroring nn.Linear's uniform(-1/sqrt(in), 1/sqrt(in)).
    bound = 1.0 / jnp.sqrt(in_features)
    weight = jax.random.uniform(kw, (out_features, in_features),
                                minval=-bound, maxval=bound, dtype=jnp.float32)
    bias = jax.random.uniform(kb, (out_features,),
                              minval=-bound, maxval=bound, dtype=jnp.float32)

    out = logistic_regression_forward(x, weight, bias)
    jax.block_until_ready(out)
    assert out.shape == (batch, out_features)

    # Reference 1: identical math (bf16 operands, f32 accumulate) in plain JAX.
    ref_bf16 = jnp.maximum(
        jax.lax.dot_general(
            x.astype(jnp.bfloat16), weight.astype(jnp.bfloat16),
            dimension_numbers=(((1,), (1,)), ((), ())),
            preferred_element_type=jnp.float32) + bias, 0.0)
    assert jnp.allclose(out, ref_bf16, atol=1e-3, rtol=1e-3)

    # Reference 2: full-f32 reference — loose tolerance covers bf16 input cast.
    ref_f32 = jnp.maximum(x @ weight.T + bias, 0.0)
    assert jnp.allclose(out, ref_f32, atol=3e-2, rtol=3e-2)

    print("KERNEL_OK")
</pallas_src>

<mosaic_0001>
module attributes {stable_mosaic.version = 11 : i64} {
  func.func @_linear_relu_kernel(%arg0: memref<8x32xf32, #tpu.memory_space<vmem>>, %arg1: memref<128x32xf32, #tpu.memory_space<vmem>>, %arg2: memref<1x128xf32, #tpu.memory_space<vmem>>, %arg3: memref<8x128xf32, #tpu.memory_space<vmem>>) attributes {dimension_semantics = [], scalar_prefetch = 0 : i64, scratch_operands = 0 : i64, tpu.core_type = #tpu.core_type<tc>} {
    %c0 = arith.constant 0 : index
    %c0_0 = arith.constant 0 : index
    %0 = vector.load %arg0[%c0, %c0_0] : memref<8x32xf32, #tpu.memory_space<vmem>>, vector<8x32xf32>
    %1 = arith.truncf %0 : vector<8x32xf32> to vector<8x32xbf16>
    %c0_1 = arith.constant 0 : index
    %c0_2 = arith.constant 0 : index
    %2 = vector.load %arg1[%c0_1, %c0_2] : memref<128x32xf32, #tpu.memory_space<vmem>>, vector<128x32xf32>
    %3 = arith.truncf %2 : vector<128x32xf32> to vector<128x32xbf16>
    %cst = arith.constant dense<0.000000e+00> : vector<8x128xf32>
    %4 = tpu.matmul %1, %3, %cst {dimension_numbers = #tpu.dot_dimension_numbers<[1], [1], [0], [0], [0, 0, 1, 0], [], []>} : vector<8x32xbf16>, vector<128x32xbf16>, vector<8x128xf32> -> vector<8x128xf32>
    %c0_3 = arith.constant 0 : index
    %c0_4 = arith.constant 0 : index
    %5 = vector.load %arg2[%c0_3, %c0_4] : memref<1x128xf32, #tpu.memory_space<vmem>>, vector<1x128xf32>
    %6 = vector.broadcast %5 : vector<1x128xf32> to vector<8x128xf32>
    %7 = arith.addf %4, %6 : vector<8x128xf32>
    %cst_5 = arith.constant 0.000000e+00 : f32
    %8 = vector.broadcast %cst_5 : f32 to vector<8x128xf32>
    %9 = arith.maximumf %7, %8 : vector<8x128xf32>
    %c0_6 = arith.constant 0 : index
    %c0_7 = arith.constant 0 : index
    %10 = vector.load %arg3[%c0_6, %c0_7] : memref<8x128xf32, #tpu.memory_space<vmem>>, vector<8x128xf32>
    tpu.vector_store %arg3[%c0_6, %c0_7], %9 {strides = array<i32>} : memref<8x128xf32, #tpu.memory_space<vmem>>, vector<8x128xf32>,
    return
  }
}

</mosaic_0001>

<bundles_post_ra>
// kernel: tpu_custom_call.1
= control target key start
LH: loop header
LB: loop body
LE: loop exit
PB: predicated region body
PF: predicated region fallthrough
CT: control target
= control target key end

     0   :  { %vm49_vm0 = vcmask 261120   ;;  %v191_v2 = vmov 0.0   ;;  %vm192_vm1 = vmmov 0   ;;  %s289_s0 = inlined_call_operand.vmem [shape: f32[8,32], index: 0, kind: input, shape index: {}]   ;;  %s290_s1 = inlined_call_operand.vmem [shape: f32[128,32], index: 1, kind: input, shape index: {}]   ;;  %s291_s2 = inlined_call_operand.vmem [shape: f32[1,128], index: 2, kind: input, shape index: {}]   ;;  %s292_s3 = inlined_call_operand.hbm [shape: f32[8,128], index: 3, kind: output, shape index: {}]  }
   0x1   :  { %v18_v0 = vld [vmem:[%s290_s1] sm:$0xff]  ;;  %v19_v1 = vld [vmem:[%s290_s1 + $0x8] sm:$0xff]  ;;  %144 = vmatprep.subr.bf16.mxu0 %v191_v2  ;;  %160 = vmatprep.mubr.msk.bf16.mxu0 %vm192_vm1, %v191_v2  ;;  %v20_v4 = vld [vmem:[%s290_s1 + $0x10] sm:$0xff] }
   0x2   :  { %v34_v3 = vpack.c.bf16 %v19_v1, %v18_v0  ;;  %v21_v5 = vld [vmem:[%s290_s1 + $0x18] sm:$0xff] }
   0x3   :  { %v35_v7 = vpack.c.bf16 %v21_v5, %v20_v4 }
   0x4   :  { %v54_v6 = vsel %vm49_vm0, %v34_v3, 0 }
   0x5   :  { %145 = vmatpush3.bf16.xpose.msra.mxu0 %v54_v6 }
   0x6   :  { %146 = vmatprep.subr.bf16.mxu0 %v191_v2 }
   0x7   :  { %8 = vsyncpa [#allocation3], 0  ;;  %v57_v8 = vsel %vm49_vm0, %v35_v7, 0  ;;  %v22_v9 = vld [vmem:[%s290_s1 + $0x20] sm:$0xff]  ;;  %v23_v10 = vld [vmem:[%s290_s1 + $0x28] sm:$0xff]  ;;  %s193_s21 = smov [#allocation2]  }
   0x8   :  { %v36_v11 = vpack.c.bf16 %v23_v10, %v22_v9  ;;  %v24_v13 = vld [vmem:[%s290_s1 + $0x30] sm:$0xff]  ;;  %v25_v14 = vld [vmem:[%s290_s1 + $0x38] sm:$0xff]  ;;  %v26_v17 = vld [vmem:[%s290_s1 + $0x40] sm:$0xff] }
   0x9   :  { %v37_v15 = vpack.c.bf16 %v25_v14, %v24_v13  ;;  %v27_v18 = vld [vmem:[%s290_s1 + $0x48] sm:$0xff]  ;;  %v28_v21 = vld [vmem:[%s290_s1 + $0x50] sm:$0xff]  ;;  %v29_v22 = vld [vmem:[%s290_s1 + $0x58] sm:$0xff] }
   0xa   :  { %v60_v12 = vsel %vm49_vm0, %v36_v11, 0  ;;  %v38_v19 = vpack.c.bf16 %v27_v18, %v26_v17  ;;  %v39_v23 = vpack.c.bf16 %v29_v22, %v28_v21  ;;  %v30_v25 = vld [vmem:[%s290_s1 + $0x60] sm:$0xff]  ;;  %v31_v26 = vld [vmem:[%s290_s1 + $0x68] sm:$0xff]  ;;  %v32_v29 = vld [vmem:[%s290_s1 + $0x70] sm:$0xff] }
   0xb   :  { %v63_v16 = vsel %vm49_vm0, %v37_v15, 0  ;;  %v40_v27 = vpack.c.bf16 %v31_v26, %v30_v25  ;;  %v33_v30 = vld [vmem:[%s290_s1 + $0x78] sm:$0xff]  ;;  %v16_v33 = vld [vmem:[%s289_s0] sm:$0xff]  ;;  %s125_s1 = sshll.u32 %s193_s21, 4  ;;  %s126_s1 = int_to_ptr.vmem [resolvable:$true] %s125_s1 }
   0xc   :  { %v66_v20 = vsel %vm49_vm0, %v38_v19, 0  ;;  %v69_v24 = vsel %vm49_vm0, %v39_v23, 0  ;;  %v41_v31 = vpack.c.bf16 %v33_v30, %v32_v29  ;;  %v17_v34 = vpack.c.bf16 %v16_v33, %v16_v33  ;;  %v133_v35 = vld [vmem:[%s291_s2] ss:$0 sm:$0xff]  ;;  %s167_s22 = scalar_lea.vmem %s126_s1, 128  ;;  %p172_p1 = scmp.lt.s32.totalorder %s126_s1, %s126_s1 }
   0xd   :  { %147 = vmatpush3.bf16.xpose.msra.mxu0 %v57_v8  ;;  %v72_v28 = vsel %vm49_vm0, %v40_v27, 0  ;;  %p168_p0 = scmp.ne.s32.totalorder %s126_s1, %s167_s22  ;;  %p173_p2 = scmp.lt.s32.totalorder %s167_s22, %s167_s22 }
   0xe   :  { %148 = vmatprep.subr.bf16.mxu0 %v191_v2  ;;  %v75_v32 = vsel %vm49_vm0, %v41_v31, 0 }
   0xf   :  { %p174_p3 = por %p173_p2, %p172_p1 }
  0x11   :  { %p175_p4 = pnand %p174_p3, %p168_p0 }
  0x15   :  { %149 = vmatpush3.bf16.xpose.msra.mxu0 %v60_v12 }
  0x16   :  { %150 = vmatprep.subr.bf16.mxu0 %v191_v2 }
  0x1d   :  { %151 = vmatpush3.bf16.xpose.msra.mxu0 %v63_v16 }
  0x1e   :  { %152 = vmatprep.subr.bf16.mxu0 %v191_v2 }
  0x25   :  { %153 = vmatpush3.bf16.xpose.msra.mxu0 %v66_v20 }
  0x26   :  { %154 = vmatprep.subr.bf16.mxu0 %v191_v2 }
  0x2d   :  { %155 = vmatpush3.bf16.xpose.msra.mxu0 %v69_v24 }
  0x2e   :  { %156 = vmatprep.subr.bf16.mxu0 %v191_v2 }
  0x35   :  { %157 = vmatpush3.bf16.xpose.msra.mxu0 %v72_v28 }
  0x36   :  { %158 = vmatprep.subr.bf16.mxu0 %v191_v2 }
  0x3d   :  { %159 = vmatpush3.bf16.xpose.msra.mxu0 %v75_v32 }
  0x44   :  { %161 = vmatmul.mubr.msk.bf16.vlgmr.msra.gmra.mrb[0].mxu0 %vm49_vm0, %v17_v34 }
 0x117   :  { %v111_v36 = vpop.f32.mrb[0].mxu0 }
 0x118   :  { %v112_v37 = vadd.f32 %v133_v35, %v111_v36  ;;  %v162_v38 = vpop.f32.mrb[1].mxu0 }
 0x119   :  { %v114_v39 = vpop.f32.mrb[2].mxu0 }
 0x11a   :  { %v117_v40 = vmax.f32 %v112_v37, 0.0  ;;  %v163_v41 = vpop.f32.mrb[3].mxu0 }
 0x11c   :  { %118 = vst [vmem:[#allocation2] sm:$0xff] %v117_v40 }
 0x11d   :  { %178 = shalt.err (!%p175_p4)
}
 0x11e   :  { %s179_s2 = scalar_lea.hbm %s292_s3, 128 }
 0x11f   :  { %p180_p5 = scmp.ne.s32.totalorder %s292_s3, %s179_s2  ;;  %p183_p6 = scmp.lt.u32.totalorder %s179_s2, %s292_s3 }
 0x121   :  { %p185_p7 = pnand %p183_p6, %p180_p5 }
 0x123   :  { %188 = shalt.err (!%p185_p7)
}
 0x124   :  { %128 = dma.vmem_to_hbm [thread:$0]  %s126_s1, 128, %s292_s3, [#allocation3]  }
 0x125   :  { %189 = dma.done.wait [#allocation3], 128  }
 0x126   :  { %190 = vsyncadd [#allocation3], 4294967168 }
 0x127   :  { %132 = vsyncpa [#allocation3], 1 }

</bundles_post_ra>
